<compile_context>
chip_gen: v7x
topology: tpu7x:2x2x1
jax: 0.10.0
libtpu: 0.0.40
codegen_flags: <defaults>
</compile_context>

<pallas_src>
import jax
import jax.numpy as jnp
from jax.experimental import pallas as pl
from jax.experimental.pallas import tpu as pltpu


_TARGET_BLOCK_BYTES = 2 * 1024 * 1024  # ~2 MiB per block


def _copy_kernel(x_ref, o_ref):
    # Identity copy of the current block.
    o_ref[...] = x_ref[...]


def _tiled_copy(slab, block_shape):
    """Tiled identity copy of a 2-D slab with aliased in/out buffers."""
    rows, cols = slab.shape
    br, bc = block_shape
    grid = (pl.cdiv(rows, br), pl.cdiv(cols, bc))
    return pl.pallas_call(
        _copy_kernel,
        out_shape=jax.ShapeDtypeStruct(slab.shape, slab.dtype),
        grid=grid,
        in_specs=[pl.BlockSpec((br, bc), lambda i, j: (i, j))],
        out_specs=pl.BlockSpec((br, bc), lambda i, j: (i, j)),
        input_output_aliases={0: 0},
        compiler_params=pltpu.CompilerParams(
            dimension_semantics=("parallel", "parallel"),
        ),
    )(slab)


def view_flatten(x):
    """Pallas equivalent of torch `x.view(x.size(0), -1)`."""
    n = x.shape[0]
    f = 1
    for d in x.shape[1:]:
        f *= d
    out_shape = (n, f)
    total = n * f
    if total == 0:
        return x.reshape(out_shape)

    itemsize = jnp.dtype(x.dtype).itemsize
    flat = x.reshape(total)  # metadata-only

    # Pack sub-32-bit dtypes into uint32 containers when that yields a
    # lane-aligned element count (keeps stores unmasked for bf16/int8/fp8).
    packed = False
    work = flat
    elem_bytes = itemsize
    if itemsize < 4 and (total * itemsize) % 4 == 0:
        ratio = 4 // itemsize
        wt_p = total // ratio
        if wt_p % 128 == 0:
            work = jax.lax.bitcast_convert_type(
                flat.reshape(wt_p, ratio), jnp.uint32)
            packed = True
            elem_bytes = 4

    wt = int(work.shape[0])

    # Preferred path: lane-dense (rows, lanes) slab over the contiguous buffer.
    lanes = 0
    for cand in (1024, 512, 256, 128):
        if wt % cand == 0:
            lanes = cand
            break

    if lanes:
        rows = wt // lanes
        sub = 8 * (4 // elem_bytes)  # min sublane multiple for this dtype
        max_rows = max(sub, _TARGET_BLOCK_BYTES // (lanes * elem_bytes))
        if rows <= max_rows:
            block_rows = rows  # full extent: always a legal block dim
        else:
            block_rows = max(sub, (max_rows // sub) * sub)
        out = _tiled_copy(work.reshape(rows, lanes), (block_rows, lanes))
        out = out.reshape(wt)
    else:
        # Fallback (element count not a multiple of 128): copy the logical
        # (N, F) view with a full-N block and a capped, 128-aligned F tile.
        slab = flat.reshape(n, f)
        if f < 128:
            block_f = f
        else:
            max_f = max(128,
                        (_TARGET_BLOCK_BYTES // max(1, n * itemsize)) // 128 * 128)
            block_f = f if f <= max_f else max_f
        out = _tiled_copy(slab, (n, block_f))
        out = out.reshape(total)

    if packed:
        out = jax.lax.bitcast_convert_type(out, x.dtype)  # (wt, ratio)
    return out.reshape(out_shape)


if __name__ == "__main__":
    key = jax.random.PRNGKey(0)

    # Primary test: batch=2, channels=4, spatial=16x16 (f32).
    x = jax.random.normal(key, (2, 4, 16, 16), dtype=jnp.float32)
    out = jax.block_until_ready(view_flatten(x))
    ref = x.reshape(x.shape[0], -1)
    assert out.shape == (2, 4 * 16 * 16), out.shape
    assert out.dtype == x.dtype
    assert jnp.array_equal(out, ref)

    # Sub-32-bit dtype path (packed into uint32 containers).
    xb = jax.random.normal(key, (2, 4, 16, 16), dtype=jnp.bfloat16)
    outb = jax.block_until_ready(view_flatten(xb))
    assert outb.shape == (2, 1024) and outb.dtype == jnp.bfloat16
    assert jnp.array_equal(outb, xb.reshape(2, -1))

    # Non-128-aligned fallback path.
    xo = jax.random.normal(key, (2, 3, 5, 5), dtype=jnp.float32)
    outo = jax.block_until_ready(view_flatten(xo))
    assert outo.shape == (2, 75)
    assert jnp.array_equal(outo, xo.reshape(2, -1))

    print("KERNEL_OK")
</pallas_src>

<mosaic_0001>
module attributes {stable_mosaic.version = 11 : i64} {
  func.func @_copy_kernel(%arg0: i32, %arg1: i32, %arg2: memref<2x1024xf32, #tpu.memory_space<vmem>>, %arg3: memref<2x1024xf32, #tpu.memory_space<vmem>>) attributes {dimension_semantics = [#tpu.dimension_semantics<parallel>, #tpu.dimension_semantics<parallel>], iteration_bounds = array<i64: 1, 1>, scalar_prefetch = 0 : i64, scratch_operands = 0 : i64, tpu.core_type = #tpu.core_type<tc>, window_params = [{transform_indices = @transform_0, window_bounds = array<i64: 2, 1024>}, {transform_indices = @transform_1, window_bounds = array<i64: 2, 1024>}]} {
    %c0 = arith.constant 0 : index
    %c0_0 = arith.constant 0 : index
    %0 = vector.load %arg2[%c0, %c0_0] : memref<2x1024xf32, #tpu.memory_space<vmem>>, vector<2x1024xf32>
    %c0_1 = arith.constant 0 : index
    %c0_2 = arith.constant 0 : index
    %1 = vector.load %arg3[%c0_1, %c0_2] : memref<2x1024xf32, #tpu.memory_space<vmem>>, vector<2x1024xf32>
    tpu.vector_store %arg3[%c0_1, %c0_2], %0 {strides = array<i32>} : memref<2x1024xf32, #tpu.memory_space<vmem>>, vector<2x1024xf32>,
    return
  }
  func.func @transform_0(%arg0: i32, %arg1: i32) -> (i32, i32) {
    %c0_i32 = arith.constant 0 : i32
    return %arg0, %arg1 : i32, i32
  }
  func.func @transform_1(%arg0: i32, %arg1: i32) -> (i32, i32) {
    %c0_i32 = arith.constant 0 : i32
    return %arg0, %arg1 : i32, i32
  }
}

</mosaic_0001>

<bundles_post_ra>
// kernel: tpu_custom_call.1
= control target key start
LH: loop header
LB: loop body
LE: loop exit
PB: predicated region body
PF: predicated region fallthrough
CT: control target
= control target key end

     0   :  { %6 = vsyncpa [#allocation3], 0  ;;  %s126_s0 = inlined_call_operand.hbm [shape: f32[2,1024], index: 0, kind: input, shape index: {}, may-alias: {0,1}]   ;;  %s127_s1 = inlined_call_operand.hbm [shape: f32[2,1024], index: 1, kind: output, shape index: {}, may-alias: {0,1}]  }
   0x1   :  { %7 = vsyncpa [#allocation4], 0  ;;  %s90_s6 = smov [#allocation2]   ;;  %s42_s10 = scalar_lea.hbm %s126_s0, 256 }
   0x2   :  { %s14_s7 = sshll.u32 %s90_s6, 4  ;;  %p43_p0 = scmp.ne.s32.totalorder %s126_s0, %s42_s10  ;;  %s15_s7 = int_to_ptr.vmem [resolvable:$true] %s14_s7 }
   0x3   :  { %p46_p1 = scmp.lt.u32.totalorder %s42_s10, %s126_s0 }
   0x5   :  { %p48_p2 = pnand %p46_p1, %p43_p0 }
   0x7   :  { %51 = shalt.err (!%p48_p2)
}
   0x8   :  { %s52_s15 = scalar_lea.vmem %s15_s7, 256  ;;  %p57_p4 = scmp.lt.s32.totalorder %s15_s7, %s15_s7 }
   0x9   :  { %p53_p3 = scmp.ne.s32.totalorder %s15_s7, %s52_s15  ;;  %p58_p5 = scmp.lt.s32.totalorder %s52_s15, %s52_s15 }
   0xb   :  { %p59_p6 = por %p58_p5, %p57_p4 }
   0xd   :  { %p60_p7 = pnand %p59_p6, %p53_p3 }
   0xf   :  { %63 = shalt.err (!%p60_p7)
}
  0x10   :  { %17 = dma.hbm_to_vmem [thread:$0]  %s126_s0, 256, %s15_s7, [#allocation3]  }
  0x11   :  { %86 = dma.done.wait [#allocation3], 256  }
  0x12   :  { %87 = vsyncadd [#allocation3], 4294967040  ;;  %s91_s18 = smov [#allocation5]   ;;  %v21_v0 = vld [vmem:[#allocation2] sm:$0xff]  ;;  %v22_v1 = vld [vmem:[#allocation2 + $0x8] sm:$0xff] }
  0x13   :  { %s31_s19 = sshll.u32 %s91_s18, 4  ;;  %23 = vst [vmem:[#allocation5] sm:$0xff] %v21_v0  ;;  %24 = vst [vmem:[#allocation5 + $0x8] sm:$0xff] %v22_v1  ;;  %s32_s19 = int_to_ptr.vmem [resolvable:$true] %s31_s19 }
  0x14   :  { %s64_s20 = scalar_lea.vmem %s32_s19, 256  ;;  %p69_p9 = scmp.lt.s32.totalorder %s32_s19, %s32_s19 }
  0x15   :  { %p65_p8 = scmp.ne.s32.totalorder %s32_s19, %s64_s20  ;;  %p70_p10 = scmp.lt.s32.totalorder %s64_s20, %s64_s20 }
  0x17   :  { %p71_p11 = por %p70_p10, %p69_p9 }
  0x19   :  { %p72_p12 = pnand %p71_p11, %p65_p8 }
  0x1b   :  { %75 = shalt.err (!%p72_p12)
}
  0x1c   :  { %s76_s0 = scalar_lea.hbm %s127_s1, 256 }
  0x1d   :  { %p77_p13 = scmp.ne.s32.totalorder %s127_s1, %s76_s0  ;;  %p80_p0 = scmp.lt.u32.totalorder %s76_s0, %s127_s1 }
  0x1f   :  { %p82_p1 = pnand %p80_p0, %p77_p13 }
  0x21   :  { %85 = shalt.err (!%p82_p1)
}
  0x22   :  { %34 = dma.vmem_to_hbm [thread:$0]  %s32_s19, 256, %s127_s1, [#allocation4]  }
  0x23   :  { %88 = dma.done.wait [#allocation4], 256  }
  0x24   :  { %89 = vsyncadd [#allocation4], 4294967040 }
  0x25   :  { %38 = vsyncpa [#allocation3], 1 }
  0x26   :  { %39 = vsyncpa [#allocation4], 1 }

</bundles_post_ra>
